<compile_context>
chip_gen: v7x
topology: tpu7x:2x2x1
jax: 0.10.0
libtpu: 0.0.40
codegen_flags: <defaults>
</compile_context>

<pallas_src>
import jax
import jax.numpy as jnp
from jax.experimental import pallas as pl
from jax.experimental.pallas import tpu as pltpu

DIM = 64            # `dim` in the PyTorch script
IN_DIM = 2 * DIM    # lin1 input features = 128
DEFAULT_TILE_N = 8192


def _round_up(x, m):
    return (x + m - 1) // m * m


def _mlp_kernel(x_ref, w1_ref, b1_ref, w2_ref, b2_ref, o_ref):
    # x:  [TILE_N, 128] f32 (cast to bf16 here; f32 accumulation on the MXU)
    # w1: [128, 64] f32     b1: [1, 64] f32
    # w2: [1, 64] f32 (row vector of lin2 weights)
    # b2: [1, 1] f32 in SMEM
    # o:  [TILE_N, 1] f32
    x = x_ref[...].astype(jnp.bfloat16)
    w1 = w1_ref[...].astype(jnp.bfloat16)
    h = jnp.dot(x, w1, preferred_element_type=jnp.float32) + b1_ref[...]
    h = jnp.maximum(h, 0.0)                                   # ReLU (VPU)
    # lin2 (out width 1): VPU multiply + XLU lane reduction instead of MXU.
    out = jnp.sum(h * w2_ref[...], axis=-1, keepdims=True) + b2_ref[0, 0]
    o_ref[...] = out.astype(o_ref.dtype)


def net_forward(x, w1, b1, w2, b2, *, tile_n=DEFAULT_TILE_N):
    """Fused lin1 -> ReLU -> lin2, batch-tiled and pipelined over HBM.

    x:  [N, 128] float32
    w1: [128, 64], b1: [1, 64], w2: [1, 64], b2: [1, 1]
    returns [N, 1] float32
    """
    n, in_dim = x.shape
    assert in_dim == IN_DIM, f"expected {IN_DIM} input features, got {in_dim}"
    assert tile_n % 8 == 0, "tile_n must be a multiple of 8 (f32 sublanes)"

    # Tile: multiple of 8 sublanes, no larger than (rounded-up) N.
    tn = min(tile_n, _round_up(n, 8))
    grid = (pl.cdiv(n, tn),)          # last block may be partial (clamped)

    cost = pl.CostEstimate(
        flops=2 * n * IN_DIM * DIM + 2 * n * DIM,
        transcendentals=0,
        bytes_accessed=n * IN_DIM * 4 + n * 4 + (IN_DIM * DIM + 2 * DIM + 1) * 4,
    )

    out = pl.pallas_call(
        _mlp_kernel,
        out_shape=jax.ShapeDtypeStruct((n, 1), jnp.float32),
        grid=grid,
        in_specs=[
            # streamed activations (f32, no wrapper-side copy/pad)
            pl.BlockSpec((tn, IN_DIM), lambda i: (i, 0)),
            # VMEM-resident parameters (constant block index across the grid)
            pl.BlockSpec((IN_DIM, DIM), lambda i: (0, 0)),
            pl.BlockSpec((1, DIM), lambda i: (0, 0)),
            pl.BlockSpec((1, DIM), lambda i: (0, 0)),
            # scalar bias in SMEM
            pl.BlockSpec(memory_space=pltpu.MemorySpace.SMEM),
        ],
        out_specs=pl.BlockSpec((tn, 1), lambda i: (i, 0)),
        compiler_params=pltpu.CompilerParams(
            dimension_semantics=("parallel",),
        ),
        cost_estimate=cost,
    )(x, w1, b1, w2, b2)

    return out


def init_params(key):
    """Deterministic init mimicking PyTorch Linear default (U(-1/sqrt(fan_in), +))."""
    k1, k2, k3, k4 = jax.random.split(key, 4)
    fan1 = IN_DIM
    fan2 = DIM
    bound1 = 1.0 / jnp.sqrt(fan1)
    bound2 = 1.0 / jnp.sqrt(fan2)
    # w1 stored as [in, out] (transposed vs torch's [out, in]) so kernel does X @ W1
    w1 = jax.random.uniform(k1, (fan1, DIM), jnp.float32, -bound1, bound1)
    b1 = jax.random.uniform(k2, (1, DIM), jnp.float32, -bound1, bound1)
    # w2 stored as a row vector [1, DIM] for the multiply+reduce second layer
    w2 = jax.random.uniform(k3, (1, DIM), jnp.float32, -bound2, bound2)
    b2 = jax.random.uniform(k4, (1, 1), jnp.float32, -bound2, bound2)
    return w1, b1, w2, b2


def _reference(x, w1, b1, w2, b2):
    # Same bf16 quantization of the matmul inputs as the kernel, f32 math.
    xb = x.astype(jnp.bfloat16).astype(jnp.float32)
    w1b = w1.astype(jnp.bfloat16).astype(jnp.float32)
    h = jnp.maximum(xb @ w1b + b1, 0.0)
    return h @ w2.T + b2


if __name__ == "__main__":
    key = jax.random.PRNGKey(0)
    k_x, k_x2, k_p = jax.random.split(key, 3)
    w1, b1, w2, b2 = init_params(k_p)

    # Small batch (single grid step, block == full batch).
    batch = 8
    x = jax.random.normal(k_x, (batch, IN_DIM), jnp.float32)
    out = jax.block_until_ready(net_forward(x, w1, b1, w2, b2))
    ref = _reference(x, w1, b1, w2, b2)
    assert out.shape == (batch, 1)
    assert jnp.allclose(out, ref, atol=1e-3, rtol=1e-3)

    # Non-multiple batch with a small tile to exercise the cdiv grid and the
    # clamped partial last block (tile_n=16 -> 3 grid steps, last one ragged).
    batch2 = 37
    x2 = jax.random.normal(k_x2, (batch2, IN_DIM), jnp.float32)
    out2 = jax.block_until_ready(net_forward(x2, w1, b1, w2, b2, tile_n=16))
    ref2 = _reference(x2, w1, b1, w2, b2)
    assert out2.shape == (batch2, 1)
    assert jnp.allclose(out2, ref2, atol=1e-3, rtol=1e-3)

    print("KERNEL_OK")
</pallas_src>

<mosaic_0001>
module attributes {stable_mosaic.version = 11 : i64} {
  func.func @_mlp_kernel(%arg0: i32, %arg1: memref<8x128xf32, #tpu.memory_space<vmem>>, %arg2: memref<128x64xf32, #tpu.memory_space<vmem>>, %arg3: memref<1x64xf32, #tpu.memory_space<vmem>>, %arg4: memref<1x64xf32, #tpu.memory_space<vmem>>, %arg5: memref<1x1xf32, #tpu.memory_space<smem>>, %arg6: memref<8x1xf32, #tpu.memory_space<vmem>>) attributes {dimension_semantics = [#tpu.dimension_semantics<parallel>], iteration_bounds = array<i64: 1>, scalar_prefetch = 0 : i64, scratch_operands = 0 : i64, tpu.core_type = #tpu.core_type<tc>, window_params = [{transform_indices = @transform_0, window_bounds = array<i64: 8, 128>}, {pipeline_mode = #tpu.pipeline_mode<synchronous>, transform_indices = @transform_1, window_bounds = array<i64: 128, 64>}, {pipeline_mode = #tpu.pipeline_mode<synchronous>, transform_indices = @transform_2, window_bounds = array<i64: 1, 64>}, {pipeline_mode = #tpu.pipeline_mode<synchronous>, transform_indices = @transform_3, window_bounds = array<i64: 1, 64>}, {transform_indices = @transform_4, window_bounds = array<i64: 1, 1>}, {transform_indices = @transform_5, window_bounds = array<i64: 8, 1>}]} {
    %c0 = arith.constant 0 : index
    %c0_0 = arith.constant 0 : index
    %0 = vector.load %arg1[%c0, %c0_0] : memref<8x128xf32, #tpu.memory_space<vmem>>, vector<8x128xf32>
    %1 = arith.truncf %0 : vector<8x128xf32> to vector<8x128xbf16>
    %c0_1 = arith.constant 0 : index
    %c0_2 = arith.constant 0 : index
    %2 = vector.load %arg2[%c0_1, %c0_2] : memref<128x64xf32, #tpu.memory_space<vmem>>, vector<128x64xf32>
    %3 = arith.truncf %2 : vector<128x64xf32> to vector<128x64xbf16>
    %cst = arith.constant dense<0.000000e+00> : vector<8x64xf32>
    %4 = tpu.matmul %1, %3, %cst {dimension_numbers = #tpu.dot_dimension_numbers<[1], [0], [0], [1], [0, 0, 1, 1], [], []>} : vector<8x128xbf16>, vector<128x64xbf16>, vector<8x64xf32> -> vector<8x64xf32>
    %c0_3 = arith.constant 0 : index
    %c0_4 = arith.constant 0 : index
    %5 = vector.load %arg3[%c0_3, %c0_4] : memref<1x64xf32, #tpu.memory_space<vmem>>, vector<1x64xf32>
    %6 = vector.broadcast %5 : vector<1x64xf32> to vector<8x64xf32>
    %7 = arith.addf %4, %6 : vector<8x64xf32>
    %cst_5 = arith.constant 0.000000e+00 : f32
    %8 = vector.broadcast %cst_5 : f32 to vector<8x64xf32>
    %9 = arith.maximumf %7, %8 : vector<8x64xf32>
    %c0_6 = arith.constant 0 : index
    %c0_7 = arith.constant 0 : index
    %10 = vector.load %arg4[%c0_6, %c0_7] : memref<1x64xf32, #tpu.memory_space<vmem>>, vector<1x64xf32>
    %11 = vector.broadcast %10 : vector<1x64xf32> to vector<8x64xf32>
    %12 = arith.mulf %9, %11 : vector<8x64xf32>
    %cst_8 = arith.constant dense<0.000000e+00> : vector<8xf32>
    %13 = vector.multi_reduction <add>, %12, %cst_8 [1] : vector<8x64xf32> to vector<8xf32>
    %14 = vector.shape_cast %13 : vector<8xf32> to vector<8x1xf32>
    %c0_9 = arith.constant 0 : index
    %c0_10 = arith.constant 0 : index
    %15 = memref.load %arg5[%c0_9, %c0_10] : memref<1x1xf32, #tpu.memory_space<smem>>
    %16 = vector.broadcast %15 : f32 to vector<8x1xf32>
    %17 = arith.addf %14, %16 : vector<8x1xf32>
    %c0_11 = arith.constant 0 : index
    %c0_12 = arith.constant 0 : index
    %18 = vector.load %arg6[%c0_11, %c0_12] : memref<8x1xf32, #tpu.memory_space<vmem>>, vector<8x1xf32>
    tpu.vector_store %arg6[%c0_11, %c0_12], %17 {strides = array<i32>} : memref<8x1xf32, #tpu.memory_space<vmem>>, vector<8x1xf32>,
    return
  }
  func.func @transform_0(%arg0: i32) -> (i32, i32) {
    %c0_i32 = arith.constant 0 : i32
    %c0_i32_0 = arith.constant 0 : i32
    return %arg0, %c0_i32 : i32, i32
  }
  func.func @transform_1(%arg0: i32) -> (i32, i32) {
    %c0_i32 = arith.constant 0 : i32
    %c0_i32_0 = arith.constant 0 : i32
    %c0_i32_1 = arith.constant 0 : i32
    return %c0_i32, %c0_i32_0 : i32, i32
  }
  func.func @transform_2(%arg0: i32) -> (i32, i32) {
    %c0_i32 = arith.constant 0 : i32
    %c0_i32_0 = arith.constant 0 : i32
    %c0_i32_1 = arith.constant 0 : i32
    return %c0_i32, %c0_i32_0 : i32, i32
  }
  func.func @transform_3(%arg0: i32) -> (i32, i32) {
    %c0_i32 = arith.constant 0 : i32
    %c0_i32_0 = arith.constant 0 : i32
    %c0_i32_1 = arith.constant 0 : i32
    return %c0_i32, %c0_i32_0 : i32, i32
  }
  func.func @transform_4(%arg0: i32) -> (i32, i32) {
    %c0_i32 = arith.constant 0 : i32
    %c0_i32_0 = arith.constant 0 : i32
    %c0_i32_1 = arith.constant 0 : i32
    return %c0_i32, %c0_i32_0 : i32, i32
  }
  func.func @transform_5(%arg0: i32) -> (i32, i32) {
    %c0_i32 = arith.constant 0 : i32
    %c0_i32_0 = arith.constant 0 : i32
    return %arg0, %c0_i32 : i32, i32
  }
}

</mosaic_0001>

<bundles_post_ra>
// kernel: tpu_custom_call.1
= control target key start
LH: loop header
LB: loop body
LE: loop exit
PB: predicated region body
PF: predicated region fallthrough
CT: control target
= control target key end

     0   :  { %v150_v0 = vmov 0.0   ;;  %vm151_vm0 = vmmov 0   ;;  %vm104_vm1 = vcmask 523264   ;;  %vm111_vm2 = vcmask 7168   ;;  %s245_s1 = inlined_call_operand.vmem [shape: f32[128,64], index: 1, kind: input, shape index: {}]   ;;  %s246_s0 = inlined_call_operand.vmem [shape: f32[8,128], index: 0, kind: input, shape index: {}]   ;;  %s247_s2 = inlined_call_operand.vmem [shape: f32[1,64], index: 2, kind: input, shape index: {}]   ;;  %s248_s3 = inlined_call_operand.vmem [shape: f32[1,64], index: 3, kind: input, shape index: {}]   ;;  %s249_s4 = inlined_call_operand.<no memory space> [shape: f32[1,1], index: 4, kind: input, shape index: {}]   ;;  %s250_s5 = inlined_call_operand.vmem [shape: f32[8,1], index: 5, kind: output, shape index: {}]  }
   0x1   :  { %128 = vmatprep.subr.bf16.mxu0 %v150_v0  ;;  %v24_v1 = vld [vmem:[%s245_s1] sm:$0xff]  ;;  %v25_v2 = vld [vmem:[%s245_s1 + $0x8] sm:$0xff]  ;;  %v26_v3 = vld [vmem:[%s245_s1 + $0x10] sm:$0xff]  ;;  %144 = vmatprep.mubr.msk.bf16.mxu0 %vm151_vm0, %v150_v0  ;;  %v109_v37 = vstv %s249_s4 }
   0x2   :  { %v40_v4 = vpack.c.bf16 %v25_v2, %v24_v1  ;;  %v27_v5 = vld [vmem:[%s245_s1 + $0x18] sm:$0xff]  ;;  %v28_v7 = vld [vmem:[%s245_s1 + $0x20] sm:$0xff]  ;;  %v29_v8 = vld [vmem:[%s245_s1 + $0x28] sm:$0xff] }
   0x3   :  { %v41_v6 = vpack.c.bf16 %v27_v5, %v26_v3  ;;  %v42_v9 = vpack.c.bf16 %v29_v8, %v28_v7  ;;  %v30_v10 = vld [vmem:[%s245_s1 + $0x30] sm:$0xff]  ;;  %v31_v11 = vld [vmem:[%s245_s1 + $0x38] sm:$0xff]  ;;  %v32_v13 = vld [vmem:[%s245_s1 + $0x40] sm:$0xff] }
   0x4   :  { %129 = vmatpush3.bf16.msra.mxu0 %v40_v4  ;;  %v43_v12 = vpack.c.bf16 %v31_v11, %v30_v10  ;;  %v33_v14 = vld [vmem:[%s245_s1 + $0x48] sm:$0xff]  ;;  %v34_v16 = vld [vmem:[%s245_s1 + $0x50] sm:$0xff]  ;;  %v35_v17 = vld [vmem:[%s245_s1 + $0x58] sm:$0xff] }
   0x5   :  { %130 = vmatprep.subr.bf16.mxu0 %v150_v0  ;;  %v44_v15 = vpack.c.bf16 %v33_v14, %v32_v13  ;;  %v45_v18 = vpack.c.bf16 %v35_v17, %v34_v16  ;;  %v36_v19 = vld [vmem:[%s245_s1 + $0x60] sm:$0xff]  ;;  %v37_v20 = vld [vmem:[%s245_s1 + $0x68] sm:$0xff]  ;;  %v38_v22 = vld [vmem:[%s245_s1 + $0x70] sm:$0xff] }
   0x6   :  { %v46_v21 = vpack.c.bf16 %v37_v20, %v36_v19  ;;  %v39_v23 = vld [vmem:[%s245_s1 + $0x78] sm:$0xff]  ;;  %v22_v25 = vld [vmem:[%s246_s0] sm:$0xff] }
   0x7   :  { %v47_v24 = vpack.c.bf16 %v39_v23, %v38_v22  ;;  %v23_v26 = vpack.c.bf16 %v22_v25, %v22_v25  ;;  %v117_v27 = vld [vmem:[%s247_s2] ss:$0 sm:$0xff] }
   0x8   :  { %131 = vmatpush3.bf16.msra.mxu0 %v41_v6  ;;  %v118_v32 = vld [vmem:[%s248_s3] ss:$0 sm:$0xff] }
   0x9   :  { %132 = vmatprep.subr.bf16.mxu0 %v150_v0 }
   0xc   :  { %133 = vmatpush3.bf16.msra.mxu0 %v42_v9 }
   0xd   :  { %134 = vmatprep.subr.bf16.mxu0 %v150_v0 }
  0x10   :  { %135 = vmatpush3.bf16.msra.mxu0 %v43_v12 }
  0x11   :  { %136 = vmatprep.subr.bf16.mxu0 %v150_v0 }
  0x14   :  { %137 = vmatpush3.bf16.msra.mxu0 %v44_v15 }
  0x15   :  { %138 = vmatprep.subr.bf16.mxu0 %v150_v0 }
  0x18   :  { %139 = vmatpush3.bf16.msra.mxu0 %v45_v18 }
  0x19   :  { %140 = vmatprep.subr.bf16.mxu0 %v150_v0 }
  0x1c   :  { %141 = vmatpush3.bf16.msra.mxu0 %v46_v21 }
  0x1d   :  { %142 = vmatprep.subr.bf16.mxu0 %v150_v0 }
  0x20   :  { %143 = vmatpush3.bf16.msra.mxu0 %v47_v24 }
  0x23   :  { %145 = vmatmul.mubr.bf16.vlgmr.msra.gmra.mrb[0].mxu0 %v23_v26 }
  0xf6   :  { %v89_v28 = vpop.f32.mrb[0].mxu0 }
  0xf7   :  { %v90_v29 = vadd.f32 %v117_v27, %v89_v28  ;;  %v146_v30 = vpop.f32.mrb[1].mxu0 }
  0xf8   :  { %v92_v31 = vpop.f32.mrb[2].mxu0 }
  0xf9   :  { %v95_v33 = vmax.f32 %v90_v29, 0.0  ;;  %v147_v34 = vpop.f32.mrb[3].mxu0 }
  0xfb   :  { %v103_v35 = vmul.f32 %v118_v32, %v95_v33 }
  0xfd   :  { %v105_v36 = vsel %vm104_vm1, %v103_v35, 0.0 }
  0xfe   :  { %106 = vadd.xlane.f32.xlu0 %v105_v36 }
 0x18b   :  { %v107_v38 = vpop.xlane.xlu0 %106 }
 0x18c   :  { %v110_v39 = vadd.f32 %v109_v37, %v107_v38 }
 0x18e   :  { %112 = vst.msk [vmem:[%s250_s5] sm:$0xff] %vm111_vm2, %v110_v39 }

</bundles_post_ra>
